<compile_context>
chip_gen: v5e
topology: v5e:2x2
jax: 0.10.0
libtpu: 0.0.40
codegen_flags: <defaults>
</compile_context>

<pallas_src>
import functools

import jax
import jax.numpy as jnp
from jax.experimental import pallas as pl
from jax.experimental.pallas import tpu as pltpu

LN_EPS = 1e-5


def _round_up(x, m):
    return ((x + m - 1) // m) * m


def _layernorm(h, gamma, beta):
    # PyTorch nn.LayerNorm semantics (biased variance, eps=1e-5), but with the
    # two reductions made independent: var = E[x^2] - mu^2.
    inv_n = 1.0 / h.shape[-1]
    s1 = jnp.sum(h, axis=-1, keepdims=True)
    s2 = jnp.sum(h * h, axis=-1, keepdims=True)
    mu = s1 * inv_n
    var = s2 * inv_n - mu * mu
    return (h - mu) * jax.lax.rsqrt(var + LN_EPS) * gamma + beta


def _actor_kernel(max_action, action_dim,
                  x_ref, w1_ref, lnp1_ref, w2_ref, lnp2_ref, wh_ref, bh_ref,
                  out_ref):
    x = x_ref[...].astype(jnp.float32)

    # --- block 1: Linear -> LayerNorm -> Tanh ---
    # lnp rows: 0 = linear bias, 1 = LN gamma, 2 = LN beta  (static slices)
    h = jnp.dot(x, w1_ref[...], preferred_element_type=jnp.float32) + lnp1_ref[0:1, :]
    h = jnp.tanh(_layernorm(h, lnp1_ref[1:2, :], lnp1_ref[2:3, :]))

    # --- block 2: Linear -> LayerNorm -> Tanh ---
    h = jnp.dot(h, w2_ref[...], preferred_element_type=jnp.float32) + lnp2_ref[0:1, :]
    h = jnp.tanh(_layernorm(h, lnp2_ref[1:2, :], lnp2_ref[2:3, :]))

    # --- fused heads: one [H, 2A] GEMM, select activation per lane half ---
    z = jnp.dot(h, wh_ref[...], preferred_element_type=jnp.float32) + bh_ref[...]
    lane = jax.lax.broadcasted_iota(jnp.int32, z.shape, dimension=1)
    out = jnp.where(lane < action_dim,
                    jnp.tanh(z) * max_action,          # mean head
                    jnp.clip(z, -20.0, 2.0))           # log_std head
    out_ref[...] = out.astype(out_ref.dtype)


def actor_forward(state, params, max_action, *, batch_tile=256):
    """state: [B, state_dim] f32.  Returns (mean [B, A], log_std [B, A])."""
    B, S = state.shape
    H = params["w1"].shape[1]
    A = params["wm"].shape[1]

    # Pack small parameters: 13 inputs -> 6 DMA'd arrays.
    lnp1 = jnp.concatenate([params["b1"], params["g1"], params["be1"]], axis=0)  # [3, H]
    lnp2 = jnp.concatenate([params["b2"], params["g2"], params["be2"]], axis=0)  # [3, H]
    wh = jnp.concatenate([params["wm"], params["wl"]], axis=1)                   # [H, 2A]
    bh = jnp.concatenate([params["bm"], params["bl"]], axis=1)                   # [1, 2A]

    # Batch tiling: one grid step per row-tile; weights stay VMEM-resident.
    tb = min(batch_tile, _round_up(B, 8))
    b_pad = _round_up(B, tb)
    if b_pad != B:
        state = jnp.pad(state, ((0, b_pad - B), (0, 0)))
    grid = (b_pad // tb,)

    out = pl.pallas_call(
        functools.partial(_actor_kernel, float(max_action), A),
        out_shape=jax.ShapeDtypeStruct((b_pad, 2 * A), jnp.float32),
        grid=grid,
        in_specs=[
            pl.BlockSpec((tb, S), lambda i: (i, 0)),        # state tile
            pl.BlockSpec((S, H), lambda i: (0, 0)),         # w1 (resident)
            pl.BlockSpec((3, H), lambda i: (0, 0)),         # b1/g1/be1 slab
            pl.BlockSpec((H, H), lambda i: (0, 0)),         # w2 (resident)
            pl.BlockSpec((3, H), lambda i: (0, 0)),         # b2/g2/be2 slab
            pl.BlockSpec((H, 2 * A), lambda i: (0, 0)),     # fused head weight
            pl.BlockSpec((1, 2 * A), lambda i: (0, 0)),     # fused head bias
        ],
        out_specs=pl.BlockSpec((tb, 2 * A), lambda i: (i, 0)),
        compiler_params=pltpu.CompilerParams(
            dimension_semantics=("parallel",)),
    )(state, params["w1"], lnp1, params["w2"], lnp2, wh, bh)

    out = out[:B]
    return out[:, :A], out[:, A:]


def init_actor_params(key, state_dim, action_dim, hidden_dim):
    """Xavier-uniform weights (PyTorch-style), zero biases, LN gamma=1/beta=0.
    Weights stored [in, out] so the kernel computes x @ W + b."""
    def xavier(k, fan_in, fan_out):
        limit = jnp.sqrt(6.0 / (fan_in + fan_out))
        return jax.random.uniform(k, (fan_in, fan_out), jnp.float32, -limit, limit)

    k1, k2, k3, k4 = jax.random.split(key, 4)
    H, S, A = hidden_dim, state_dim, action_dim
    return {
        "w1": xavier(k1, S, H), "b1": jnp.zeros((1, H), jnp.float32),
        "g1": jnp.ones((1, H), jnp.float32), "be1": jnp.zeros((1, H), jnp.float32),
        "w2": xavier(k2, H, H), "b2": jnp.zeros((1, H), jnp.float32),
        "g2": jnp.ones((1, H), jnp.float32), "be2": jnp.zeros((1, H), jnp.float32),
        "wm": xavier(k3, H, A), "bm": jnp.zeros((1, A), jnp.float32),
        "wl": xavier(k4, H, A), "bl": jnp.zeros((1, A), jnp.float32),
    }


def actor_forward_ref(state, params, max_action):
    """Pure-JAX reference (PyTorch-faithful formulation)."""
    def ln(h, g, b):
        mu = jnp.mean(h, axis=-1, keepdims=True)
        var = jnp.mean((h - mu) ** 2, axis=-1, keepdims=True)
        return (h - mu) / jnp.sqrt(var + LN_EPS) * g + b

    h = jnp.tanh(ln(state @ params["w1"] + params["b1"], params["g1"], params["be1"]))
    h = jnp.tanh(ln(h @ params["w2"] + params["b2"], params["g2"], params["be2"]))
    mean = jnp.tanh(h @ params["wm"] + params["bm"]) * max_action
    log_std = jnp.clip(h @ params["wl"] + params["bl"], -20.0, 2.0)
    return mean, log_std


if __name__ == "__main__":
    key = jax.random.PRNGKey(0)
    k_param, k_state = jax.random.split(key)

    batch, state_dim, action_dim, hidden_dim = 8, 16, 8, 128
    max_action = 2.0

    params = init_actor_params(k_param, state_dim, action_dim, hidden_dim)
    state = jax.random.normal(k_state, (batch, state_dim), jnp.float32)

    mean, log_std = actor_forward(state, params, max_action)
    jax.block_until_ready((mean, log_std))

    mean_ref, log_std_ref = actor_forward_ref(state, params, max_action)
    assert mean.shape == (batch, action_dim) and log_std.shape == (batch, action_dim)
    assert jnp.allclose(mean, mean_ref, atol=1e-4, rtol=1e-4)
    assert jnp.allclose(log_std, log_std_ref, atol=1e-4, rtol=1e-4)

    print("KERNEL_OK")
</pallas_src>

<mosaic_0001>
module attributes {stable_mosaic.version = 11 : i64} {
  func.func @_actor_kernel(%arg0: i32, %arg1: memref<8x16xf32, #tpu.memory_space<vmem>>, %arg2: memref<16x128xf32, #tpu.memory_space<vmem>>, %arg3: memref<3x128xf32, #tpu.memory_space<vmem>>, %arg4: memref<128x128xf32, #tpu.memory_space<vmem>>, %arg5: memref<3x128xf32, #tpu.memory_space<vmem>>, %arg6: memref<128x16xf32, #tpu.memory_space<vmem>>, %arg7: memref<1x16xf32, #tpu.memory_space<vmem>>, %arg8: memref<8x16xf32, #tpu.memory_space<vmem>>) attributes {dimension_semantics = [#tpu.dimension_semantics<parallel>], iteration_bounds = array<i64: 1>, scalar_prefetch = 0 : i64, scratch_operands = 0 : i64, tpu.core_type = #tpu.core_type<tc>, window_params = [{transform_indices = @transform_0, window_bounds = array<i64: 8, 16>}, {pipeline_mode = #tpu.pipeline_mode<synchronous>, transform_indices = @transform_1, window_bounds = array<i64: 16, 128>}, {pipeline_mode = #tpu.pipeline_mode<synchronous>, transform_indices = @transform_2, window_bounds = array<i64: 3, 128>}, {pipeline_mode = #tpu.pipeline_mode<synchronous>, transform_indices = @transform_3, window_bounds = array<i64: 128, 128>}, {pipeline_mode = #tpu.pipeline_mode<synchronous>, transform_indices = @transform_4, window_bounds = array<i64: 3, 128>}, {pipeline_mode = #tpu.pipeline_mode<synchronous>, transform_indices = @transform_5, window_bounds = array<i64: 128, 16>}, {pipeline_mode = #tpu.pipeline_mode<synchronous>, transform_indices = @transform_6, window_bounds = array<i64: 1, 16>}, {transform_indices = @transform_7, window_bounds = array<i64: 8, 16>}]} {
    %c0 = arith.constant 0 : index
    %c0_0 = arith.constant 0 : index
    %0 = vector.load %arg1[%c0, %c0_0] : memref<8x16xf32, #tpu.memory_space<vmem>>, vector<8x16xf32>
    %c0_1 = arith.constant 0 : index
    %c0_2 = arith.constant 0 : index
    %1 = vector.load %arg2[%c0_1, %c0_2] : memref<16x128xf32, #tpu.memory_space<vmem>>, vector<16x128xf32>
    %cst = arith.constant dense<0.000000e+00> : vector<8x128xf32>
    %2 = tpu.matmul %0, %1, %cst {dimension_numbers = #tpu.dot_dimension_numbers<[1], [0], [0], [1], [0, 0, 1, 1], [], []>} : vector<8x16xf32>, vector<16x128xf32>, vector<8x128xf32> -> vector<8x128xf32>
    %c0_3 = arith.constant 0 : index
    %c0_4 = arith.constant 0 : index
    %3 = vector.load %arg3[%c0_3, %c0_4] : memref<3x128xf32, #tpu.memory_space<vmem>>, vector<1x128xf32>
    %4 = vector.broadcast %3 : vector<1x128xf32> to vector<8x128xf32>
    %5 = arith.addf %2, %4 : vector<8x128xf32>
    %c1 = arith.constant 1 : index
    %c0_5 = arith.constant 0 : index
    %6 = vector.load %arg3[%c1, %c0_5] : memref<3x128xf32, #tpu.memory_space<vmem>>, vector<1x128xf32>
    %c2 = arith.constant 2 : index
    %c0_6 = arith.constant 0 : index
    %7 = vector.load %arg3[%c2, %c0_6] : memref<3x128xf32, #tpu.memory_space<vmem>>, vector<1x128xf32>
    %cst_7 = arith.constant dense<0.000000e+00> : vector<8xf32>
    %8 = vector.multi_reduction <add>, %5, %cst_7 [1] : vector<8x128xf32> to vector<8xf32>
    %9 = vector.shape_cast %8 : vector<8xf32> to vector<8x1xf32>
    %10 = arith.mulf %5, %5 : vector<8x128xf32>
    %cst_8 = arith.constant dense<0.000000e+00> : vector<8xf32>
    %11 = vector.multi_reduction <add>, %10, %cst_8 [1] : vector<8x128xf32> to vector<8xf32>
    %12 = vector.shape_cast %11 : vector<8xf32> to vector<8x1xf32>
    %cst_9 = arith.constant 7.812500e-03 : f32
    %13 = vector.broadcast %cst_9 : f32 to vector<8x1xf32>
    %14 = arith.mulf %9, %13 : vector<8x1xf32>
    %cst_10 = arith.constant 7.812500e-03 : f32
    %15 = vector.broadcast %cst_10 : f32 to vector<8x1xf32>
    %16 = arith.mulf %12, %15 : vector<8x1xf32>
    %17 = arith.mulf %14, %14 : vector<8x1xf32>
    %18 = arith.subf %16, %17 : vector<8x1xf32>
    %19 = vector.broadcast %14 : vector<8x1xf32> to vector<8x128xf32>
    %20 = arith.subf %5, %19 : vector<8x128xf32>
    %cst_11 = arith.constant 9.99999974E-6 : f32
    %21 = vector.broadcast %cst_11 : f32 to vector<8x1xf32>
    %22 = arith.addf %18, %21 : vector<8x1xf32>
    %23 = math.rsqrt %22 : vector<8x1xf32>
    %24 = vector.broadcast %23 : vector<8x1xf32> to vector<8x128xf32>
    %25 = arith.mulf %20, %24 : vector<8x128xf32>
    %26 = vector.broadcast %6 : vector<1x128xf32> to vector<8x128xf32>
    %27 = arith.mulf %25, %26 : vector<8x128xf32>
    %28 = vector.broadcast %7 : vector<1x128xf32> to vector<8x128xf32>
    %29 = arith.addf %27, %28 : vector<8x128xf32>
    %30 = math.tanh %29 : vector<8x128xf32>
    %c0_12 = arith.constant 0 : index
    %c0_13 = arith.constant 0 : index
    %31 = vector.load %arg4[%c0_12, %c0_13] : memref<128x128xf32, #tpu.memory_space<vmem>>, vector<128x128xf32>
    %cst_14 = arith.constant dense<0.000000e+00> : vector<8x128xf32>
    %32 = tpu.matmul %30, %31, %cst_14 {dimension_numbers = #tpu.dot_dimension_numbers<[1], [0], [0], [1], [0, 0, 1, 1], [], []>} : vector<8x128xf32>, vector<128x128xf32>, vector<8x128xf32> -> vector<8x128xf32>
    %c0_15 = arith.constant 0 : index
    %c0_16 = arith.constant 0 : index
    %33 = vector.load %arg5[%c0_15, %c0_16] : memref<3x128xf32, #tpu.memory_space<vmem>>, vector<1x128xf32>
    %34 = vector.broadcast %33 : vector<1x128xf32> to vector<8x128xf32>
    %35 = arith.addf %32, %34 : vector<8x128xf32>
    %c1_17 = arith.constant 1 : index
    %c0_18 = arith.constant 0 : index
    %36 = vector.load %arg5[%c1_17, %c0_18] : memref<3x128xf32, #tpu.memory_space<vmem>>, vector<1x128xf32>
    %c2_19 = arith.constant 2 : index
    %c0_20 = arith.constant 0 : index
    %37 = vector.load %arg5[%c2_19, %c0_20] : memref<3x128xf32, #tpu.memory_space<vmem>>, vector<1x128xf32>
    %cst_21 = arith.constant dense<0.000000e+00> : vector<8xf32>
    %38 = vector.multi_reduction <add>, %35, %cst_21 [1] : vector<8x128xf32> to vector<8xf32>
    %39 = vector.shape_cast %38 : vector<8xf32> to vector<8x1xf32>
    %40 = arith.mulf %35, %35 : vector<8x128xf32>
    %cst_22 = arith.constant dense<0.000000e+00> : vector<8xf32>
    %41 = vector.multi_reduction <add>, %40, %cst_22 [1] : vector<8x128xf32> to vector<8xf32>
    %42 = vector.shape_cast %41 : vector<8xf32> to vector<8x1xf32>
    %cst_23 = arith.constant 7.812500e-03 : f32
    %43 = vector.broadcast %cst_23 : f32 to vector<8x1xf32>
    %44 = arith.mulf %39, %43 : vector<8x1xf32>
    %cst_24 = arith.constant 7.812500e-03 : f32
    %45 = vector.broadcast %cst_24 : f32 to vector<8x1xf32>
    %46 = arith.mulf %42, %45 : vector<8x1xf32>
    %47 = arith.mulf %44, %44 : vector<8x1xf32>
    %48 = arith.subf %46, %47 : vector<8x1xf32>
    %49 = vector.broadcast %44 : vector<8x1xf32> to vector<8x128xf32>
    %50 = arith.subf %35, %49 : vector<8x128xf32>
    %cst_25 = arith.constant 9.99999974E-6 : f32
    %51 = vector.broadcast %cst_25 : f32 to vector<8x1xf32>
    %52 = arith.addf %48, %51 : vector<8x1xf32>
    %53 = math.rsqrt %52 : vector<8x1xf32>
    %54 = vector.broadcast %53 : vector<8x1xf32> to vector<8x128xf32>
    %55 = arith.mulf %50, %54 : vector<8x128xf32>
    %56 = vector.broadcast %36 : vector<1x128xf32> to vector<8x128xf32>
    %57 = arith.mulf %55, %56 : vector<8x128xf32>
    %58 = vector.broadcast %37 : vector<1x128xf32> to vector<8x128xf32>
    %59 = arith.addf %57, %58 : vector<8x128xf32>
    %60 = math.tanh %59 : vector<8x128xf32>
    %c0_26 = arith.constant 0 : index
    %c0_27 = arith.constant 0 : index
    %61 = vector.load %arg6[%c0_26, %c0_27] : memref<128x16xf32, #tpu.memory_space<vmem>>, vector<128x16xf32>
    %cst_28 = arith.constant dense<0.000000e+00> : vector<8x16xf32>
    %62 = tpu.matmul %60, %61, %cst_28 {dimension_numbers = #tpu.dot_dimension_numbers<[1], [0], [0], [1], [0, 0, 1, 1], [], []>} : vector<8x128xf32>, vector<128x16xf32>, vector<8x16xf32> -> vector<8x16xf32>
    %c0_29 = arith.constant 0 : index
    %c0_30 = arith.constant 0 : index
    %63 = vector.load %arg7[%c0_29, %c0_30] : memref<1x16xf32, #tpu.memory_space<vmem>>, vector<1x16xf32>
    %64 = vector.broadcast %63 : vector<1x16xf32> to vector<8x16xf32>
    %65 = arith.addf %62, %64 : vector<8x16xf32>
    %66 = tpu.iota {dimensions = array<i32: 1>} : vector<8x16xi32>
    %c8_i32 = arith.constant 8 : i32
    %67 = vector.broadcast %c8_i32 : i32 to vector<8x16xi32>
    %68 = arith.cmpi slt, %66, %67 : vector<8x16xi32>
    %69 = math.tanh %65 : vector<8x16xf32>
    %cst_31 = arith.constant 2.000000e+00 : f32
    %70 = vector.broadcast %cst_31 : f32 to vector<8x16xf32>
    %71 = arith.mulf %69, %70 : vector<8x16xf32>
    %cst_32 = arith.constant -2.000000e+01 : f32
    %cst_33 = arith.constant 2.000000e+00 : f32
    %72 = vector.broadcast %cst_32 : f32 to vector<8x16xf32>
    %73 = arith.maximumf %72, %65 : vector<8x16xf32>
    %74 = vector.broadcast %cst_33 : f32 to vector<8x16xf32>
    %75 = arith.minimumf %74, %73 : vector<8x16xf32>
    %76 = arith.select %68, %71, %75 : vector<8x16xi1>, vector<8x16xf32>
    %c0_34 = arith.constant 0 : index
    %c0_35 = arith.constant 0 : index
    %77 = vector.load %arg8[%c0_34, %c0_35] : memref<8x16xf32, #tpu.memory_space<vmem>>, vector<8x16xf32>
    tpu.vector_store %arg8[%c0_34, %c0_35], %76 {strides = array<i32>} : memref<8x16xf32, #tpu.memory_space<vmem>>, vector<8x16xf32>,
    return
  }
  func.func @transform_0(%arg0: i32) -> (i32, i32) {
    %c0_i32 = arith.constant 0 : i32
    %c0_i32_0 = arith.constant 0 : i32
    return %arg0, %c0_i32 : i32, i32
  }
  func.func @transform_1(%arg0: i32) -> (i32, i32) {
    %c0_i32 = arith.constant 0 : i32
    %c0_i32_0 = arith.constant 0 : i32
    %c0_i32_1 = arith.constant 0 : i32
    return %c0_i32, %c0_i32_0 : i32, i32
  }
  func.func @transform_2(%arg0: i32) -> (i32, i32) {
    %c0_i32 = arith.constant 0 : i32
    %c0_i32_0 = arith.constant 0 : i32
    %c0_i32_1 = arith.constant 0 : i32
    return %c0_i32, %c0_i32_0 : i32, i32
  }
  func.func @transform_3(%arg0: i32) -> (i32, i32) {
    %c0_i32 = arith.constant 0 : i32
    %c0_i32_0 = arith.constant 0 : i32
    %c0_i32_1 = arith.constant 0 : i32
    return %c0_i32, %c0_i32_0 : i32, i32
  }
  func.func @transform_4(%arg0: i32) -> (i32, i32) {
    %c0_i32 = arith.constant 0 : i32
    %c0_i32_0 = arith.constant 0 : i32
    %c0_i32_1 = arith.constant 0 : i32
    return %c0_i32, %c0_i32_0 : i32, i32
  }
  func.func @transform_5(%arg0: i32) -> (i32, i32) {
    %c0_i32 = arith.constant 0 : i32
    %c0_i32_0 = arith.constant 0 : i32
    %c0_i32_1 = arith.constant 0 : i32
    return %c0_i32, %c0_i32_0 : i32, i32
  }
  func.func @transform_6(%arg0: i32) -> (i32, i32) {
    %c0_i32 = arith.constant 0 : i32
    %c0_i32_0 = arith.constant 0 : i32
    %c0_i32_1 = arith.constant 0 : i32
    return %c0_i32, %c0_i32_0 : i32, i32
  }
  func.func @transform_7(%arg0: i32) -> (i32, i32) {
    %c0_i32 = arith.constant 0 : i32
    %c0_i32_0 = arith.constant 0 : i32
    return %arg0, %c0_i32 : i32, i32
  }
}

</mosaic_0001>

<bundles_post_ra>
// kernel: tpu_custom_call.1
= control target key start
LH: loop header
LB: loop body
LE: loop exit
PB: predicated region body
PF: predicated region fallthrough
CT: control target
= control target key end

     0   :  { %12 = vsyncpa [#allocation3], 0  ;;  %s547_s0 = inlined_call_operand.hbm [shape: f32[8,16], index: 0, kind: input, shape index: {}]   ;;  %s548_s1 = inlined_call_operand.vmem [shape: f32[16,128], index: 1, kind: input, shape index: {}]   ;;  %s549_s2 = inlined_call_operand.hbm [shape: f32[3,128], index: 2, kind: input, shape index: {}]   ;;  %s550_s3 = inlined_call_operand.vmem [shape: f32[128,128], index: 3, kind: input, shape index: {}]   ;;  %s551_s4 = inlined_call_operand.hbm [shape: f32[3,128], index: 4, kind: input, shape index: {}]   ;;  %s552_s5 = inlined_call_operand.vmem [shape: f32[128,16], index: 5, kind: input, shape index: {}]   ;;  %s553_s6 = inlined_call_operand.vmem [shape: f32[1,16], index: 6, kind: input, shape index: {}]   ;;  %s554_s7 = inlined_call_operand.hbm [shape: f32[8,16], index: 7, kind: output, shape index: {}]  }
   0x1   :  { %13 = vsyncpa [#allocation6], 0  ;;  %s33_s26 = sshll.u32 %s549_s2, 4  ;;  %s34_s26 = int_to_ptr.hbm [resolvable:$true] %s33_s26 }
   0x2   :  { %14 = vsyncpa [#allocation4], 0  ;;  %s384_s27 = smov [#allocation5]   ;;  %s20_s8 = sshll.u32 %s547_s0, 4  ;;  %s21_s8 = int_to_ptr.hbm [resolvable:$true] %s20_s8 }
   0x3   :  { %s35_s28 = sshll.u32 %s384_s27, 4  ;;  %s385_s9 = smov [#allocation2]   ;;  %s36_s28 = int_to_ptr.vmem [resolvable:$true] %s35_s28 }
   0x4   :  { %38 = dma.hbm_to_vmem [thread:$0]  %s34_s26, 64, %s36_s28, [#allocation6]  }
   0x5   :  { %s22_s10 = sshll.u32 %s385_s9, 4  ;;  %s46_s13 = sshll.u32 %s551_s4, 4  ;;  %s23_s10 = int_to_ptr.vmem [resolvable:$true] %s22_s10  ;;  %s47_s13 = int_to_ptr.hbm [resolvable:$true] %s46_s13 }
   0x6   :  { %25 = dma.hbm_to_vmem [thread:$0]  %s21_s8, 128, %s23_s10, [#allocation3]  }
   0x7   :  { %s386_s2 = smov [#allocation7]  }
   0x8   :  { %s48_s14 = sshll.u32 %s386_s2, 4  ;;  %s49_s14 = int_to_ptr.vmem [resolvable:$true] %s48_s14 }
   0x9   :  { %51 = dma.hbm_to_vmem [thread:$0]  %s47_s13, 64, %s49_s14, [#allocation6]  }
   0xa   :  { %378 = dma.done.wait [#allocation3], 128  }
   0xb   :  { %379 = vsyncadd [#allocation3], 4294967168 }
   0xc   :  { %380 = dma.done.wait [#allocation6], 128  }
   0xd   :  { %381 = vsyncadd [#allocation6], 4294967168  ;;  %v70_v0 = vld [vmem:[%s548_s1 + $0x8] sm:$0xff]  ;;  %v69_v1 = vld [vmem:[%s548_s1] sm:$0xff]  ;;  %vm73_vm0 = vcmask 130048   ;;  %s387_s25 = smov [#allocation8]  }
   0xe   :  { %91 = vmatpush.msra.mxu0 %v70_v0  ;;  %v68_v2 = vld [vmem:[#allocation2] sm:$0xff]  ;;  %v265_v3 = vld [vmem:[#allocation5] ss:$0 sm:$0xff]  ;;  %v141_v7 = vld [vmem:[%s550_s3 + $0x78] sm:$0xff]  ;;  %s247_s26 = sshll.u32 %s387_s25, 4  ;;  %s249_s29 = sshll.u32 %s554_s7, 4  ;;  %s248_s26 = int_to_ptr.vmem [resolvable:$true] %s247_s26  ;;  %s250_s29 = int_to_ptr.hbm [resolvable:$true] %s249_s29 }
   0xf   :  { %144 = vmatpush.msra.mxu1 %v141_v7  ;;  %v140_v8 = vld [vmem:[%s550_s3 + $0x70] sm:$0xff]  ;;  %v139_v9 = vld [vmem:[%s550_s3 + $0x68] sm:$0xff]  ;;  %v138_v10 = vld [vmem:[%s550_s3 + $0x60] sm:$0xff] }
  0x10   :  { %92 = vmatpush.msra.mxu0 %v69_v1  ;;  %v137_v11 = vld [vmem:[%s550_s3 + $0x58] sm:$0xff]  ;;  %v136_v12 = vld [vmem:[%s550_s3 + $0x50] sm:$0xff]  ;;  %v135_v13 = vld [vmem:[%s550_s3 + $0x48] sm:$0xff] }
  0x11   :  { %260 = vmatmul.msk.f32.vlgmr.msra.gmra.mxu0 %vm73_vm0, %v68_v2  ;;  %145 = vmatpush.msra.mxu1 %v140_v8  ;;  %v134_v14 = vld [vmem:[%s550_s3 + $0x40] sm:$0xff]  ;;  %v133_v15 = vld [vmem:[%s550_s3 + $0x38] sm:$0xff]  ;;  %v132_v17 = vld [vmem:[%s550_s3 + $0x30] sm:$0xff] }
  0x12   :  { %v131_v18 = vld [vmem:[%s550_s3 + $0x28] sm:$0xff]  ;;  %v130_v19 = vld [vmem:[%s550_s3 + $0x20] sm:$0xff]  ;;  %v129_v20 = vld [vmem:[%s550_s3 + $0x18] sm:$0xff] }
  0x13   :  { %146 = vmatpush.msra.mxu1 %v139_v9  ;;  %v128_v22 = vld [vmem:[%s550_s3 + $0x10] sm:$0xff]  ;;  %v127_v24 = vld [vmem:[%s550_s3 + $0x8] sm:$0xff]  ;;  %v126_v27 = vld [vmem:[%s550_s3] sm:$0xff] }
  0x14   :  { %v266_v37 = vld [vmem:[#allocation5 + $0x1] ss:$0 sm:$0xff]  ;;  %v267_v40 = vld [vmem:[#allocation5 + $0x2] ss:$0 sm:$0xff]  ;;  %v268_v44 = vld [vmem:[#allocation7] ss:$0 sm:$0xff] }
  0x15   :  { %147 = vmatpush.msra.mxu1 %v138_v10  ;;  %v208_v48 = vld [vmem:[%s552_s5 + $0x78] sm:$0xff]  ;;  %v207_v49 = vld [vmem:[%s552_s5 + $0x70] sm:$0xff]  ;;  %v206_v50 = vld [vmem:[%s552_s5 + $0x68] sm:$0xff] }
  0x16   :  { %213 = vmatpush.msra.mxu2 %v208_v48  ;;  %v205_v51 = vld [vmem:[%s552_s5 + $0x60] sm:$0xff]  ;;  %v204_v52 = vld [vmem:[%s552_s5 + $0x58] sm:$0xff]  ;;  %v203_v53 = vld [vmem:[%s552_s5 + $0x50] sm:$0xff] }
  0x17   :  { %148 = vmatpush.msra.mxu1 %v137_v11  ;;  %v202_v54 = vld [vmem:[%s552_s5 + $0x48] sm:$0xff]  ;;  %v201_v55 = vld [vmem:[%s552_s5 + $0x40] sm:$0xff]  ;;  %v200_v56 = vld [vmem:[%s552_s5 + $0x38] sm:$0xff] }
  0x18   :  { %214 = vmatpush.msra.mxu2 %v207_v49  ;;  %v199_v58 = vld [vmem:[%s552_s5 + $0x30] sm:$0xff]  ;;  %v198_v59 = vld [vmem:[%s552_s5 + $0x28] sm:$0xff]  ;;  %v197_v60 = vld [vmem:[%s552_s5 + $0x20] sm:$0xff] }
  0x19   :  { %149 = vmatpush.msra.mxu1 %v136_v12  ;;  %v196_v61 = vld [vmem:[%s552_s5 + $0x18] sm:$0xff]  ;;  %v195_v63 = vld [vmem:[%s552_s5 + $0x10] sm:$0xff]  ;;  %v194_v1 = vld [vmem:[%s552_s5 + $0x8] sm:$0xff] }
  0x1a   :  { %215 = vmatpush.msra.mxu2 %v206_v50 }
  0x1b   :  { %150 = vmatpush.msra.mxu1 %v135_v13 }
  0x1c   :  { %216 = vmatpush.msra.mxu2 %v205_v51 }
  0x1d   :  { %151 = vmatpush.msra.mxu1 %v134_v14  ;;  %v269_v14 = vld [vmem:[#allocation7 + $0x1] ss:$0 sm:$0xff] }
  0x1e   :  { %217 = vmatpush.msra.mxu2 %v204_v52 }
  0x1f   :  { %152 = vmatpush.msra.mxu1 %v133_v15 }
  0x20   :  { %218 = vmatpush.msra.mxu2 %v203_v53 }
  0x21   :  { %153 = vmatpush.msra.mxu1 %v132_v17  ;;  %v270_v17 = vld [vmem:[#allocation7 + $0x2] ss:$0 sm:$0xff] }
  0x22   :  { %219 = vmatpush.msra.mxu2 %v202_v54 }
  0x23   :  { %154 = vmatpush.msra.mxu1 %v131_v18 }
  0x24   :  { %220 = vmatpush.msra.mxu2 %v201_v55 }
  0x25   :  { %155 = vmatpush.msra.mxu1 %v130_v19 }
  0x26   :  { %221 = vmatpush.msra.mxu2 %v200_v56 }
  0x27   :  { %156 = vmatpush.msra.mxu1 %v129_v20 }
  0x28   :  { %222 = vmatpush.msra.mxu2 %v199_v58 }
  0x29   :  { %157 = vmatpush.msra.mxu1 %v128_v22 }
  0x2a   :  { %223 = vmatpush.msra.mxu2 %v198_v59 }
  0x2b   :  { %158 = vmatpush.msra.mxu1 %v127_v24  ;;  %v233_v24 = vlaneseq }
  0x2c   :  { %224 = vmatpush.msra.mxu2 %v197_v60 }
  0x2d   :  { %159 = vmatpush.msra.mxu1 %v126_v27 }
  0x2e   :  { %225 = vmatpush.msra.mxu2 %v196_v61 }
  0x30   :  { %226 = vmatpush.msra.mxu2 %v195_v63 }
  0x32   :  { %227 = vmatpush.msra.mxu2 %v194_v1 }
  0x8e   :  { %v94_v4 = vpop.f32.mrf.mxu0 }
  0x8f   :  { %v95_v5 = vadd.f32 %v265_v3, %v94_v4  ;;  %v193_v4 = vld [vmem:[%s552_s5] sm:$0xff] }
  0x90   :  { %228 = vmatpush.msra.mxu2 %v193_v4 }
  0x91   :  { %99 = vadd.xlane.f32.xlu0 %v95_v5  ;;  %v101_v6 = vmul.f32 %v95_v5, %v95_v5 }
  0x99   :  { %102 = vadd.xlane.f32.xlu0 %v101_v6 }
 0x104   :  { %v100_v16 = vpop.xlane.xlu0 %99 }
 0x105   :  { %v104_v21 = vmul.f32 0.0078125, %v100_v16 }
 0x107   :  { %v106_v25 = vmul.f32 %v104_v21, %v104_v21  ;;  %v108_v36 = vsub.f32 %v95_v5, %v104_v21  ;;  %v271_v21 = vld [vmem:[%s553_s6] ss:$0 sm:$0xff] }
 0x10c   :  { %v103_v23 = vpop.xlane.xlu0 %102 }
 0x10d   :  { %v105_v26 = vmul.f32 0.0078125, %v103_v23 }
 0x10f   :  { %v107_v28 = vsub.f32 %v105_v26, %v106_v25  ;;  %v234_v25 = vand.u32 127, %v233_v24 }
 0x111   :  { %v109_v29 = vadd.f32 1e-05, %v107_v28  ;;  %vm235_vm7 = vcmp.lt.s32.totalorder %v234_v25, 8 }
 0x113   :  { %272 = vrsqrt.f32 %v109_v29  ;;  %vm116_vm2 = vweird.f32 %v109_v29 }
 0x119   :  { %v273_v30 = vpop.eup %272 }
 0x11a   :  { %v111_v31 = vmul.f32 %v273_v30, %v109_v29  ;;  %vm117_vm1 = vweird.f32 %v273_v30 }
 0x11b   :  { %vm118_vm3 = vmor %vm116_vm2, %vm117_vm1 }
 0x11c   :  { %v112_v32 = vmul.f32 %v273_v30, %v111_v31 }
 0x11e   :  { %v113_v33 = vmul.f32 0.5, %v112_v32 }
 0x120   :  { %v114_v34 = vsub.f32 1.5, %v113_v33 }
 0x122   :  { %v115_v35 = vmul.f32 %v273_v30, %v114_v34 }
 0x124   :  { %v119_v38 = vsel %vm118_vm3, %v273_v30, %v115_v35 }
 0x125   :  { %v120_v39 = vmul.f32 %v119_v38, %v108_v36 }
 0x127   :  { %v122_v41 = vmul.f32 %v266_v37, %v120_v39 }
 0x129   :  { %v124_v42 = vadd.f32 %v267_v40, %v122_v41 }
 0x12b   :  { %274 = vtanh.f32 %v124_v42 }
 0x131   :  { %v275_v43 = vpop.eup %274 }
 0x132   :  { %160 = vmatmul.f32.vlgmr.msra.gmra.mxu1 %v275_v43 }
 0x1af   :  { %v161_v45 = vpop.f32.mrf.mxu1 }
 0x1b0   :  { %v162_v46 = vadd.f32 %v268_v44, %v161_v45 }
 0x1b2   :  { %166 = vadd.xlane.f32.xlu1 %v162_v46  ;;  %v168_v47 = vmul.f32 %v162_v46, %v162_v46 }
 0x1ba   :  { %169 = vadd.xlane.f32.xlu1 %v168_v47 }
 0x225   :  { %v167_v57 = vpop.xlane.xlu1 %166 }
 0x226   :  { %v171_v62 = vmul.f32 0.0078125, %v167_v57 }
 0x228   :  { %v173_v2 = vmul.f32 %v171_v62, %v171_v62  ;;  %v175_v13 = vsub.f32 %v162_v46, %v171_v62 }
 0x22d   :  { %v170_v0 = vpop.xlane.xlu1 %169 }
 0x22e   :  { %v172_v3 = vmul.f32 0.0078125, %v170_v0 }
 0x230   :  { %v174_v5 = vsub.f32 %v172_v3, %v173_v2 }
 0x232   :  { %v176_v6 = vadd.f32 1e-05, %v174_v5 }
 0x234   :  { %276 = vrsqrt.f32 %v176_v6  ;;  %vm183_vm5 = vweird.f32 %v176_v6 }
 0x23a   :  { %v277_v7 = vpop.eup %276 }
 0x23b   :  { %v178_v8 = vmul.f32 %v277_v7, %v176_v6  ;;  %vm184_vm4 = vweird.f32 %v277_v7 }
 0x23c   :  { %vm185_vm6 = vmor %vm183_vm5, %vm184_vm4 }
 0x23d   :  { %v179_v9 = vmul.f32 %v277_v7, %v178_v8 }
 0x23f   :  { %v180_v10 = vmul.f32 0.5, %v179_v9 }
 0x241   :  { %v181_v11 = vsub.f32 1.5, %v180_v10 }
 0x243   :  { %v182_v12 = vmul.f32 %v277_v7, %v181_v11 }
 0x245   :  { %v186_v15 = vsel %vm185_vm6, %v277_v7, %v182_v12 }
 0x246   :  { %v187_v16 = vmul.f32 %v186_v15, %v175_v13 }
 0x248   :  { %v189_v18 = vmul.f32 %v269_v14, %v187_v16 }
 0x24a   :  { %v191_v19 = vadd.f32 %v270_v17, %v189_v18 }
 0x24c   :  { %278 = vtanh.f32 %v191_v19 }
 0x252   :  { %v279_v20 = vpop.eup %278 }
 0x253   :  { %229 = vmatmul.f32.vlgmr.msra.gmra.mxu2 %v279_v20 }
 0x2d6   :  { %v230_v22 = vpop.f32.mrf.mxu2 }
 0x2d7   :  { %v231_v23 = vadd.f32 %v271_v21, %v230_v22 }
 0x2d9   :  { %280 = vtanh.f32 %v231_v23  ;;  %v238_v26 = vmax.f32 %v231_v23, -20.0 }
 0x2db   :  { %v239_v29 = vmin.f32 %v238_v26, 2.0 }
 0x2df   :  { %v281_v27 = vpop.eup %280 }
 0x2e0   :  { %v237_v28 = vmul.f32 2.0, %v281_v27 }
 0x2e2   :  { %v240_v30 = vsel %vm235_vm7, %v237_v28, %v239_v29 }
 0x2e3   :  { %241 = vst.msk [vmem:[#allocation8] sm:$0xff] %vm73_vm0, %v240_v30 }
 0x2e4   :  { %252 = dma.vmem_to_hbm [thread:$0]  %s248_s26, 128, %s250_s29, [#allocation4]  }
 0x2e5   :  { %382 = dma.done.wait [#allocation4], 128  }
 0x2e6   :  { %383 = vsyncadd [#allocation4], 4294967168 }
 0x2e7   :  { %257 = vsyncpa [#allocation3], 1 }
 0x2e8   :  { %258 = vsyncpa [#allocation6], 1 }
 0x2e9   :  { %259 = vsyncpa [#allocation4], 1 }

</bundles_post_ra>
